<compile_context>
chip_gen: v6e
topology: v6e:2x2x1
jax: 0.10.0
libtpu: 0.0.40
codegen_flags: <defaults>
</compile_context>

<pallas_src>
import jax
import jax.numpy as jnp
from jax.experimental import pallas as pl
from jax.experimental.pallas import tpu as pltpu


def _linear_hardsigmoid_kernel(x_ref, w_ref, b_ref, o_ref):
    # x_ref: (Bt, 1) f32, w_ref/b_ref: (1, out_features) f32 (pre-folded).
    # Single broadcast FMA + clip on the VPU; no MXU, no lane concat.
    o_ref[...] = jnp.clip(x_ref[...] * w_ref[...] + b_ref[...], 0.0, 1.0)


def linear_hardsigmoid(x, weight, bias, *, block_b=512):
    """x: (B, 1) f32; weight: torch layout (out, in) = (2, 1); bias: (2,) -> (B, 2)."""
    B, in_features = x.shape
    out_features = weight.shape[0]
    assert in_features == 1 and weight.shape[1] == 1

    # Fold the hardsigmoid affine (y + 3) / 6 into the parameters once, host-side.
    w_scaled = (weight.T / 6.0).astype(jnp.float32)                      # (1, out)
    b_scaled = ((bias + 3.0) / 6.0).reshape(1, out_features).astype(jnp.float32)

    out_shape = jax.ShapeDtypeStruct((B, out_features), jnp.float32)

    if B <= block_b or B % block_b != 0:
        # Degenerate single-block launch: full-array VMEM refs, no grid.
        return pl.pallas_call(
            _linear_hardsigmoid_kernel,
            out_shape=out_shape,
            in_specs=[
                pl.BlockSpec(memory_space=pltpu.MemorySpace.VMEM),
                pl.BlockSpec(memory_space=pltpu.MemorySpace.VMEM),
                pl.BlockSpec(memory_space=pltpu.MemorySpace.VMEM),
            ],
            out_specs=pl.BlockSpec(memory_space=pltpu.MemorySpace.VMEM),
        )(x, w_scaled, b_scaled)

    # Scaled path: tile the batch axis (row block multiple of 8), double-buffered
    # by BlockSpec pipelining, batch axis parallel for megacore sharding (v7x).
    grid = (B // block_b,)
    return pl.pallas_call(
        _linear_hardsigmoid_kernel,
        out_shape=out_shape,
        grid_spec=pltpu.PrefetchScalarGridSpec(
            num_scalar_prefetch=0,
            grid=grid,
            in_specs=[
                pl.BlockSpec((block_b, in_features), lambda i: (i, 0)),
                pl.BlockSpec((1, out_features), lambda i: (0, 0)),
                pl.BlockSpec((1, out_features), lambda i: (0, 0)),
            ],
            out_specs=pl.BlockSpec((block_b, out_features), lambda i: (i, 0)),
        ),
        compiler_params=pltpu.CompilerParams(
            dimension_semantics=("parallel",)),
    )(x, w_scaled, b_scaled)


if __name__ == "__main__":
    key = jax.random.PRNGKey(0)
    kx, kw, kb = jax.random.split(key, 3)

    # Deterministic "Linear(1, 2)" parameters (synthetic init, torch layout).
    weight = jax.random.normal(kw, (2, 1), dtype=jnp.float32) * 0.5   # (out, in)
    bias = jax.random.normal(kb, (2,), dtype=jnp.float32) * 0.1       # (out,)

    # Input: batch=2, in_features=1 (the shape Linear(1, 2) actually accepts).
    x = jax.random.normal(kx, (2, 1), dtype=jnp.float32)

    out = jax.block_until_ready(linear_hardsigmoid(x, weight, bias))

    # Reference check in plain JAX (un-folded formulation).
    ref = jnp.clip(x @ weight.T + bias.reshape(1, -1) + 3.0, 0.0, 6.0) / 6.0
    assert out.shape == (2, 2)
    assert jnp.allclose(out, ref, atol=1e-6), (out, ref)

    print("KERNEL_OK")
</pallas_src>

<mosaic_0001>
module attributes {stable_mosaic.version = 11 : i64} {
  func.func @_linear_hardsigmoid_kernel(%arg0: memref<2x1xf32, #tpu.memory_space<vmem>>, %arg1: memref<1x2xf32, #tpu.memory_space<vmem>>, %arg2: memref<1x2xf32, #tpu.memory_space<vmem>>, %arg3: memref<2x2xf32, #tpu.memory_space<vmem>>) attributes {dimension_semantics = [], scalar_prefetch = 0 : i64, scratch_operands = 0 : i64, tpu.core_type = #tpu.core_type<tc>} {
    %c0 = arith.constant 0 : index
    %c0_0 = arith.constant 0 : index
    %0 = vector.load %arg0[%c0, %c0_0] : memref<2x1xf32, #tpu.memory_space<vmem>>, vector<2x1xf32>
    %c0_1 = arith.constant 0 : index
    %c0_2 = arith.constant 0 : index
    %1 = vector.load %arg1[%c0_1, %c0_2] : memref<1x2xf32, #tpu.memory_space<vmem>>, vector<1x2xf32>
    %2 = vector.broadcast %0 : vector<2x1xf32> to vector<2x2xf32>
    %3 = vector.broadcast %1 : vector<1x2xf32> to vector<2x2xf32>
    %4 = arith.mulf %2, %3 : vector<2x2xf32>
    %c0_3 = arith.constant 0 : index
    %c0_4 = arith.constant 0 : index
    %5 = vector.load %arg2[%c0_3, %c0_4] : memref<1x2xf32, #tpu.memory_space<vmem>>, vector<1x2xf32>
    %6 = vector.broadcast %5 : vector<1x2xf32> to vector<2x2xf32>
    %7 = arith.addf %4, %6 : vector<2x2xf32>
    %cst = arith.constant 0.000000e+00 : f32
    %cst_5 = arith.constant 1.000000e+00 : f32
    %8 = vector.broadcast %cst : f32 to vector<2x2xf32>
    %9 = arith.maximumf %8, %7 : vector<2x2xf32>
    %10 = vector.broadcast %cst_5 : f32 to vector<2x2xf32>
    %11 = arith.minimumf %10, %9 : vector<2x2xf32>
    %c0_6 = arith.constant 0 : index
    %c0_7 = arith.constant 0 : index
    %12 = vector.load %arg3[%c0_6, %c0_7] : memref<2x2xf32, #tpu.memory_space<vmem>>, vector<2x2xf32>
    tpu.vector_store %arg3[%c0_6, %c0_7], %11 {strides = array<i32>} : memref<2x2xf32, #tpu.memory_space<vmem>>, vector<2x2xf32>,
    return
  }
}

</mosaic_0001>

<bundles_post_ra>
// kernel: tpu_custom_call.1
= control target key start
LH: loop header
LB: loop body
LE: loop exit
PB: predicated region body
PF: predicated region fallthrough
CT: control target
= control target key end

     0   :  { %v82_v1 = vmov 0   ;;  %s116_s0 = inlined_call_operand.vmem [shape: f32[2,1], index: 0, kind: input, shape index: {}]   ;;  %s117_s1 = inlined_call_operand.vmem [shape: f32[1,2], index: 1, kind: input, shape index: {}]   ;;  %s118_s2 = inlined_call_operand.vmem [shape: f32[1,2], index: 2, kind: input, shape index: {}]   ;;  %s119_s3 = inlined_call_operand.hbm [shape: f32[2,2], index: 3, kind: output, shape index: {}]  }
   0x1   :  { %v15_v0 = vld [vmem:[%s116_s0] sm:$0x3]  ;;  %59 = vset.pattern.permute.xlu0 %v82_v1 }
   0x2   :  { %8 = vsyncpa [#allocation3], 0  ;;  %19 = vperm.xlu0 %59, %v15_v0   ;;  %v55_v2 = vld [vmem:[%s117_s1] ss:$0 sm:$0xff]  ;;  %s83_s18 = smov [#allocation2]   ;;  %vm39_vm0 = vcmask 9216  }
   0x3   :  { %v56_v3 = vld [vmem:[%s118_s2] ss:$0 sm:$0xff]  ;;  %s47_s19 = sshll.u32 %s83_s18, 4  ;;  %s48_s19 = int_to_ptr.vmem [resolvable:$true] %s47_s19 }
   0x4   :  { %s60_s0 = scalar_lea.vmem %s48_s19, 32  ;;  %p65_p1 = scmp.lt.s32.totalorder %s48_s19, %s48_s19 }
   0x5   :  { %p61_p0 = scmp.ne.s32.totalorder %s48_s19, %s60_s0  ;;  %p66_p2 = scmp.lt.s32.totalorder %s60_s0, %s60_s0 }
   0x7   :  { %p67_p3 = por %p66_p2, %p65_p1 }
   0x9   :  { %p68_p4 = pnand %p67_p3, %p61_p0 }
  0x7d   :  { %v20_v4 = vpop.permute.xlu0 %19 }
  0x7e   :  { %v28_v5 = vmul.f32 %v55_v2, %v20_v4 }
  0x80   :  { %v36_v6 = vadd.f32 %v56_v3, %v28_v5 }
  0x82   :  { %v37_v7 = vmax.f32 %v36_v6, 0.0 }
  0x84   :  { %v38_v8 = vmin.f32 %v37_v7, 1.0 }
  0x86   :  { %40 = vst.msk [vmem:[#allocation2] sm:$0x3] %vm39_vm0, %v38_v8 }
  0x87   :  { %71 = shalt.err (!%p68_p4)
}
  0x88   :  { %50 = dma.vmem_to_hbm [thread:$0]  %s48_s19, 32, %s119_s3, [#allocation3]  }
  0x89   :  { %80 = dma.done.wait [#allocation3], 32  }
  0x8a   :  { %81 = vsyncadd [#allocation3], 4294967264 }
  0x8b   :  { %54 = vsyncpa [#allocation3], 1 }

</bundles_post_ra>
